<compile_context>
chip_gen: v7x
topology: tpu7x:2x2x1
jax: 0.10.0
libtpu: 0.0.40
codegen_flags: <defaults>
</compile_context>

<pallas_src>
import jax
import jax.numpy as jnp
from jax.experimental import pallas as pl
from jax.experimental.pallas import tpu as pltpu

LANE = 128
OUT_PAD = 8          # narrow lane-slab output: col0=q1, col1=q2, col2=q_min


def _round_up(x, m):
    return ((x + m - 1) // m) * m


def _mish(x):
    # mish(x) = x * tanh(softplus(x)); single exp, overflow-safe.
    # tanh(log1p(e)) = ((1+e)^2 - 1) / ((1+e)^2 + 1) = e*(e+2) / (e*(e+2) + 2)
    e = jnp.exp(jnp.minimum(x, 20.0))
    num = e * (e + 2.0)
    t = num * pl.reciprocal(num + 2.0, approx=True)   # EUP slot, frees VALU
    return jnp.where(x > 20.0, x, x * t)


def _fused_critic_kernel(sa_ref, *refs):
    """refs = (w0, b0, w1, b1, ..., w_head, b_head, out_ref)."""
    out_ref = refs[-1]
    params = refs[:-1]

    # Layer 0: single K=S+A matmul (input pre-concatenated in the wrapper).
    w0 = params[0][...]
    h = jnp.dot(sa_ref[...].astype(w0.dtype), w0,
                preferred_element_type=jnp.float32) + params[1][...]
    h = _mish(h)

    rest = params[2:]
    n_rest = len(rest) // 2
    for i in range(n_rest):
        w = rest[2 * i][...]
        b = rest[2 * i + 1][...]
        h = jnp.dot(h.astype(w.dtype), w,
                    preferred_element_type=jnp.float32) + b
        if i != n_rest - 1:               # no activation after the final head
            h = _mish(h)

    # Epilogue: fuse q_min = min(q1, q2) into column 2 of the narrow slab.
    qmin = jnp.minimum(h[:, 0:1], h[:, 1:2])        # (TM, 1)
    lane = jax.lax.broadcasted_iota(jnp.int32, h.shape, 1)
    out = jnp.where(lane == 2, qmin, h)             # cols: q1, q2, qmin, 0...
    out_ref[...] = out.astype(out_ref.dtype)


def make_critic_params(key, state_dim, action_dim, hidden_dim, num_layers):
    """Raw per-network layers; weights stored [in, out] so kernel does h @ W + b."""
    inp_dim = state_dim + action_dim
    in_dims = [inp_dim] + [hidden_dim] * num_layers
    out_dims = [hidden_dim] * num_layers + [1]
    params = {}
    for net in ("q1", "q2"):
        layers = []
        for di, do in zip(in_dims, out_dims):
            key, kw, kb = jax.random.split(key, 3)
            bound = 1.0 / (di ** 0.5)
            w = jax.random.uniform(kw, (di, do), jnp.float32, -bound, bound)
            b = jax.random.uniform(kb, (1, do), jnp.float32, -bound, bound)
            layers.append((w, b))
        params[net] = layers
    return params


def fuse_critic_params(params, state_dim, action_dim, *,
                       weights_dtype=jnp.float32):
    """One-time prep: pack q1/q2 into a single lane block (q2 at offset H),
    pad jointly to round_up(2H, 128), and build the narrow 8-lane head."""
    q1, q2 = params["q1"], params["q2"]
    assert len(q1) >= 2, "num_layers must be >= 1"
    H = q1[0][0].shape[1]
    L = _round_up(2 * H, LANE)

    # Layer 0: [S+A, L] with q1 in lanes [0,H), q2 in lanes [H,2H).
    (w1, b1), (w2, b2) = q1[0], q2[0]
    w0 = jnp.zeros((state_dim + action_dim, L), jnp.float32)
    w0 = w0.at[:, :H].set(w1).at[:, H:2 * H].set(w2)
    b0 = jnp.zeros((1, L), jnp.float32)
    b0 = b0.at[:, :H].set(b1).at[:, H:2 * H].set(b2)
    fused = [w0.astype(weights_dtype), b0]          # biases stay f32

    # Hidden layers: block-diagonal [L, L].
    for i in range(1, len(q1) - 1):
        (w1, b1), (w2, b2) = q1[i], q2[i]
        w = jnp.zeros((L, L), jnp.float32)
        w = w.at[:H, :H].set(w1).at[H:2 * H, H:2 * H].set(w2)
        b = jnp.zeros((1, L), jnp.float32)
        b = b.at[:, :H].set(b1).at[:, H:2 * H].set(b2)
        fused += [w.astype(weights_dtype), b]

    # Final heads: [L, 8]; q1 -> column 0, q2 -> column 1, rest exactly zero.
    (w1, b1), (w2, b2) = q1[-1], q2[-1]
    w = jnp.zeros((L, OUT_PAD), jnp.float32)
    w = w.at[:H, 0:1].set(w1).at[H:2 * H, 1:2].set(w2)
    b = jnp.zeros((1, OUT_PAD), jnp.float32)
    b = b.at[:, 0:1].set(b1).at[:, 1:2].set(b2)
    fused += [w.astype(weights_dtype), b]
    return fused


def _pick_batch_tile(B, max_tile):
    full = min(max_tile, _round_up(B, 8))
    half = min(max_tile, _round_up((B + 1) // 2, 8))
    # v7x has 2 TensorCores: prefer >=2 grid steps when each half-tile is
    # still large enough (>=128 rows) to amortize ~0.35us/step overhead;
    # otherwise keep a single big tile (best for 1-TC v5e/v6e & tiny batches).
    return half if half >= 128 else full


def _critic_out(fused, state, action, *, max_tile=1024):
    """Returns the (B, 8) slab: col0=q1, col1=q2, col2=min(q1,q2)."""
    B, S = state.shape
    _, A = action.shape
    sa = jnp.concatenate([state, action], axis=-1)   # (B, S+A), 64 B/row

    TM = _pick_batch_tile(B, max_tile)
    B_pad = _round_up(B, TM)
    if B_pad != B:
        sa = jnp.pad(sa, ((0, B_pad - B), (0, 0)))

    in_specs = [pl.BlockSpec((TM, S + A), lambda i: (i, 0))]
    for p in fused:
        # Full-shape blocks with constant index_map -> weights stay VMEM
        # resident across batch tiles.
        in_specs.append(pl.BlockSpec(p.shape, lambda i: (0, 0)))

    out = pl.pallas_call(
        _fused_critic_kernel,
        out_shape=jax.ShapeDtypeStruct((B_pad, OUT_PAD), jnp.float32),
        grid=(B_pad // TM,),
        in_specs=in_specs,
        out_specs=pl.BlockSpec((TM, OUT_PAD), lambda i: (i, 0)),
        compiler_params=pltpu.CompilerParams(
            dimension_semantics=("parallel",)),
    )(sa, *fused)
    return out[:B]


def critic_forward(fused, state, action, **kw):
    """Fused twin-Q forward. Returns (q1, q2), each (B, 1) float32."""
    out = _critic_out(fused, state, action, **kw)
    return out[:, 0:1], out[:, 1:2]


def critic_q_min(fused, state, action, **kw):
    """min(q1, q2), computed inside the kernel epilogue."""
    out = _critic_out(fused, state, action, **kw)
    return out[:, 2:3]


# ---------------- pure-JAX reference (matches PyTorch semantics) -------------
def _mish_ref(x):
    return x * jnp.tanh(jax.nn.softplus(x))


def _mlp_ref(sa, layers):
    h = sa
    for i, (w, b) in enumerate(layers):
        h = h @ w + b
        if i != len(layers) - 1:
            h = _mish_ref(h)
    return h


if __name__ == "__main__":
    state_dim, action_dim = 12, 4
    hidden_dim, num_layers = 32, 2
    batch = 8

    key = jax.random.PRNGKey(0)
    kp, ks, ka = jax.random.split(key, 3)
    raw_params = make_critic_params(kp, state_dim, action_dim,
                                    hidden_dim, num_layers)

    state = jax.random.normal(ks, (batch, state_dim), jnp.float32)
    action = jax.random.normal(ka, (batch, action_dim), jnp.float32)

    sa = jnp.concatenate([state, action], axis=-1)
    q1_ref = _mlp_ref(sa, raw_params["q1"])
    q2_ref = _mlp_ref(sa, raw_params["q2"])

    # ---- f32-weight path (exact up to the EUP approx reciprocal in mish) ----
    fused_f32 = fuse_critic_params(raw_params, state_dim, action_dim)
    q1, q2 = critic_forward(fused_f32, state, action)
    q1, q2 = jax.block_until_ready(q1), jax.block_until_ready(q2)
    assert q1.shape == (batch, 1) and q2.shape == (batch, 1)
    assert jnp.allclose(q1, q1_ref, atol=2e-3, rtol=2e-3), \
        float(jnp.max(jnp.abs(q1 - q1_ref)))
    assert jnp.allclose(q2, q2_ref, atol=2e-3, rtol=2e-3), \
        float(jnp.max(jnp.abs(q2 - q2_ref)))

    qmin = jax.block_until_ready(critic_q_min(fused_f32, state, action))
    assert jnp.allclose(qmin, jnp.minimum(q1_ref, q2_ref),
                        atol=2e-3, rtol=2e-3)

    # ---- bf16 matmul-operand path (v6e/v7x MXU friendly; f32 accumulate) ----
    fused_bf16 = fuse_critic_params(raw_params, state_dim, action_dim,
                                    weights_dtype=jnp.bfloat16)
    q1b, q2b = critic_forward(fused_bf16, state, action)
    q1b, q2b = jax.block_until_ready(q1b), jax.block_until_ready(q2b)
    assert jnp.allclose(q1b, q1_ref, atol=5e-2, rtol=5e-2)
    assert jnp.allclose(q2b, q2_ref, atol=5e-2, rtol=5e-2)

    print("KERNEL_OK")
</pallas_src>

<mosaic_0001>
module attributes {stable_mosaic.version = 11 : i64} {
  func.func @_fused_critic_kernel(%arg0: i32, %arg1: memref<8x16xf32, #tpu.memory_space<vmem>>, %arg2: memref<16x128xf32, #tpu.memory_space<vmem>>, %arg3: memref<1x128xf32, #tpu.memory_space<vmem>>, %arg4: memref<128x128xf32, #tpu.memory_space<vmem>>, %arg5: memref<1x128xf32, #tpu.memory_space<vmem>>, %arg6: memref<128x8xf32, #tpu.memory_space<vmem>>, %arg7: memref<1x8xf32, #tpu.memory_space<vmem>>, %arg8: memref<8x8xf32, #tpu.memory_space<vmem>>) attributes {dimension_semantics = [#tpu.dimension_semantics<parallel>], iteration_bounds = array<i64: 1>, scalar_prefetch = 0 : i64, scratch_operands = 0 : i64, tpu.core_type = #tpu.core_type<tc>, window_params = [{transform_indices = @transform_0, window_bounds = array<i64: 8, 16>}, {pipeline_mode = #tpu.pipeline_mode<synchronous>, transform_indices = @transform_1, window_bounds = array<i64: 16, 128>}, {pipeline_mode = #tpu.pipeline_mode<synchronous>, transform_indices = @transform_2, window_bounds = array<i64: 1, 128>}, {pipeline_mode = #tpu.pipeline_mode<synchronous>, transform_indices = @transform_3, window_bounds = array<i64: 128, 128>}, {pipeline_mode = #tpu.pipeline_mode<synchronous>, transform_indices = @transform_4, window_bounds = array<i64: 1, 128>}, {pipeline_mode = #tpu.pipeline_mode<synchronous>, transform_indices = @transform_5, window_bounds = array<i64: 128, 8>}, {pipeline_mode = #tpu.pipeline_mode<synchronous>, transform_indices = @transform_6, window_bounds = array<i64: 1, 8>}, {transform_indices = @transform_7, window_bounds = array<i64: 8, 8>}]} {
    %c0 = arith.constant 0 : index
    %c0_0 = arith.constant 0 : index
    %0 = vector.load %arg2[%c0, %c0_0] : memref<16x128xf32, #tpu.memory_space<vmem>>, vector<16x128xf32>
    %c0_1 = arith.constant 0 : index
    %c0_2 = arith.constant 0 : index
    %1 = vector.load %arg1[%c0_1, %c0_2] : memref<8x16xf32, #tpu.memory_space<vmem>>, vector<8x16xf32>
    %cst = arith.constant dense<0.000000e+00> : vector<8x128xf32>
    %2 = tpu.matmul %1, %0, %cst {dimension_numbers = #tpu.dot_dimension_numbers<[1], [0], [0], [1], [0, 0, 1, 1], [], []>} : vector<8x16xf32>, vector<16x128xf32>, vector<8x128xf32> -> vector<8x128xf32>
    %c0_3 = arith.constant 0 : index
    %c0_4 = arith.constant 0 : index
    %3 = vector.load %arg3[%c0_3, %c0_4] : memref<1x128xf32, #tpu.memory_space<vmem>>, vector<1x128xf32>
    %4 = vector.broadcast %3 : vector<1x128xf32> to vector<8x128xf32>
    %5 = arith.addf %2, %4 : vector<8x128xf32>
    %cst_5 = arith.constant 2.000000e+01 : f32
    %6 = vector.broadcast %cst_5 : f32 to vector<8x128xf32>
    %7 = arith.minimumf %5, %6 : vector<8x128xf32>
    %8 = math.exp %7 : vector<8x128xf32>
    %cst_6 = arith.constant 2.000000e+00 : f32
    %9 = vector.broadcast %cst_6 : f32 to vector<8x128xf32>
    %10 = arith.addf %8, %9 : vector<8x128xf32>
    %11 = arith.mulf %8, %10 : vector<8x128xf32>
    %cst_7 = arith.constant 2.000000e+00 : f32
    %12 = vector.broadcast %cst_7 : f32 to vector<8x128xf32>
    %13 = arith.addf %11, %12 : vector<8x128xf32>
    %14 = tpu.reciprocal %13 {approx = true} : vector<8x128xf32> -> vector<8x128xf32>
    %15 = arith.mulf %11, %14 : vector<8x128xf32>
    %cst_8 = arith.constant 2.000000e+01 : f32
    %16 = vector.broadcast %cst_8 : f32 to vector<8x128xf32>
    %17 = arith.cmpf ogt, %5, %16 : vector<8x128xf32>
    %18 = arith.mulf %5, %15 : vector<8x128xf32>
    %19 = arith.select %17, %5, %18 : vector<8x128xi1>, vector<8x128xf32>
    %c0_9 = arith.constant 0 : index
    %c0_10 = arith.constant 0 : index
    %20 = vector.load %arg4[%c0_9, %c0_10] : memref<128x128xf32, #tpu.memory_space<vmem>>, vector<128x128xf32>
    %c0_11 = arith.constant 0 : index
    %c0_12 = arith.constant 0 : index
    %21 = vector.load %arg5[%c0_11, %c0_12] : memref<1x128xf32, #tpu.memory_space<vmem>>, vector<1x128xf32>
    %cst_13 = arith.constant dense<0.000000e+00> : vector<8x128xf32>
    %22 = tpu.matmul %19, %20, %cst_13 {dimension_numbers = #tpu.dot_dimension_numbers<[1], [0], [0], [1], [0, 0, 1, 1], [], []>} : vector<8x128xf32>, vector<128x128xf32>, vector<8x128xf32> -> vector<8x128xf32>
    %23 = vector.broadcast %21 : vector<1x128xf32> to vector<8x128xf32>
    %24 = arith.addf %22, %23 : vector<8x128xf32>
    %cst_14 = arith.constant 2.000000e+01 : f32
    %25 = vector.broadcast %cst_14 : f32 to vector<8x128xf32>
    %26 = arith.minimumf %24, %25 : vector<8x128xf32>
    %27 = math.exp %26 : vector<8x128xf32>
    %cst_15 = arith.constant 2.000000e+00 : f32
    %28 = vector.broadcast %cst_15 : f32 to vector<8x128xf32>
    %29 = arith.addf %27, %28 : vector<8x128xf32>
    %30 = arith.mulf %27, %29 : vector<8x128xf32>
    %cst_16 = arith.constant 2.000000e+00 : f32
    %31 = vector.broadcast %cst_16 : f32 to vector<8x128xf32>
    %32 = arith.addf %30, %31 : vector<8x128xf32>
    %33 = tpu.reciprocal %32 {approx = true} : vector<8x128xf32> -> vector<8x128xf32>
    %34 = arith.mulf %30, %33 : vector<8x128xf32>
    %cst_17 = arith.constant 2.000000e+01 : f32
    %35 = vector.broadcast %cst_17 : f32 to vector<8x128xf32>
    %36 = arith.cmpf ogt, %24, %35 : vector<8x128xf32>
    %37 = arith.mulf %24, %34 : vector<8x128xf32>
    %38 = arith.select %36, %24, %37 : vector<8x128xi1>, vector<8x128xf32>
    %c0_18 = arith.constant 0 : index
    %c0_19 = arith.constant 0 : index
    %39 = vector.load %arg6[%c0_18, %c0_19] : memref<128x8xf32, #tpu.memory_space<vmem>>, vector<128x8xf32>
    %c0_20 = arith.constant 0 : index
    %c0_21 = arith.constant 0 : index
    %40 = vector.load %arg7[%c0_20, %c0_21] : memref<1x8xf32, #tpu.memory_space<vmem>>, vector<1x8xf32>
    %cst_22 = arith.constant dense<0.000000e+00> : vector<8x8xf32>
    %41 = tpu.matmul %38, %39, %cst_22 {dimension_numbers = #tpu.dot_dimension_numbers<[1], [0], [0], [1], [0, 0, 1, 1], [], []>} : vector<8x128xf32>, vector<128x8xf32>, vector<8x8xf32> -> vector<8x8xf32>
    %42 = vector.broadcast %40 : vector<1x8xf32> to vector<8x8xf32>
    %43 = arith.addf %41, %42 : vector<8x8xf32>
    %44 = vector.extract_strided_slice %43 {offsets = [0, 0], sizes = [8, 1], strides = [1, 1]} : vector<8x8xf32> to vector<8x1xf32>
    %45 = vector.extract_strided_slice %43 {offsets = [0, 1], sizes = [8, 1], strides = [1, 1]} : vector<8x8xf32> to vector<8x1xf32>
    %46 = arith.minimumf %44, %45 : vector<8x1xf32>
    %47 = tpu.iota {dimensions = array<i32: 1>} : vector<8x8xi32>
    %c2_i32 = arith.constant 2 : i32
    %48 = vector.broadcast %c2_i32 : i32 to vector<8x8xi32>
    %49 = arith.cmpi eq, %47, %48 : vector<8x8xi32>
    %50 = vector.shape_cast %46 : vector<8x1xf32> to vector<8x1xf32>
    %51 = vector.broadcast %50 : vector<8x1xf32> to vector<8x8xf32>
    %52 = arith.select %49, %51, %43 : vector<8x8xi1>, vector<8x8xf32>
    %c0_23 = arith.constant 0 : index
    %c0_24 = arith.constant 0 : index
    %53 = vector.load %arg8[%c0_23, %c0_24] : memref<8x8xf32, #tpu.memory_space<vmem>>, vector<8x8xf32>
    tpu.vector_store %arg8[%c0_23, %c0_24], %52 {strides = array<i32>} : memref<8x8xf32, #tpu.memory_space<vmem>>, vector<8x8xf32>,
    return
  }
  func.func @transform_0(%arg0: i32) -> (i32, i32) {
    %c0_i32 = arith.constant 0 : i32
    %c0_i32_0 = arith.constant 0 : i32
    return %arg0, %c0_i32 : i32, i32
  }
  func.func @transform_1(%arg0: i32) -> (i32, i32) {
    %c0_i32 = arith.constant 0 : i32
    %c0_i32_0 = arith.constant 0 : i32
    %c0_i32_1 = arith.constant 0 : i32
    return %c0_i32, %c0_i32_0 : i32, i32
  }
  func.func @transform_2(%arg0: i32) -> (i32, i32) {
    %c0_i32 = arith.constant 0 : i32
    %c0_i32_0 = arith.constant 0 : i32
    %c0_i32_1 = arith.constant 0 : i32
    return %c0_i32, %c0_i32_0 : i32, i32
  }
  func.func @transform_3(%arg0: i32) -> (i32, i32) {
    %c0_i32 = arith.constant 0 : i32
    %c0_i32_0 = arith.constant 0 : i32
    %c0_i32_1 = arith.constant 0 : i32
    return %c0_i32, %c0_i32_0 : i32, i32
  }
  func.func @transform_4(%arg0: i32) -> (i32, i32) {
    %c0_i32 = arith.constant 0 : i32
    %c0_i32_0 = arith.constant 0 : i32
    %c0_i32_1 = arith.constant 0 : i32
    return %c0_i32, %c0_i32_0 : i32, i32
  }
  func.func @transform_5(%arg0: i32) -> (i32, i32) {
    %c0_i32 = arith.constant 0 : i32
    %c0_i32_0 = arith.constant 0 : i32
    %c0_i32_1 = arith.constant 0 : i32
    return %c0_i32, %c0_i32_0 : i32, i32
  }
  func.func @transform_6(%arg0: i32) -> (i32, i32) {
    %c0_i32 = arith.constant 0 : i32
    %c0_i32_0 = arith.constant 0 : i32
    %c0_i32_1 = arith.constant 0 : i32
    return %c0_i32, %c0_i32_0 : i32, i32
  }
  func.func @transform_7(%arg0: i32) -> (i32, i32) {
    %c0_i32 = arith.constant 0 : i32
    %c0_i32_0 = arith.constant 0 : i32
    return %arg0, %c0_i32 : i32, i32
  }
}

</mosaic_0001>

<bundles_post_ra>
// kernel: tpu_custom_call.1
= control target key start
LH: loop header
LB: loop body
LE: loop exit
PB: predicated region body
PF: predicated region fallthrough
CT: control target
= control target key end

     0   :  { %12 = vsyncpa [#allocation3], 0  ;;  %s794_s0 = inlined_call_operand.hbm [shape: f32[8,16], index: 0, kind: input, shape index: {}]   ;;  %s795_s1 = inlined_call_operand.vmem [shape: f32[16,128], index: 1, kind: input, shape index: {}]   ;;  %s796_s2 = inlined_call_operand.vmem [shape: f32[1,128], index: 2, kind: input, shape index: {}]   ;;  %s797_s3 = inlined_call_operand.vmem [shape: f32[128,128], index: 3, kind: input, shape index: {}]   ;;  %s798_s4 = inlined_call_operand.vmem [shape: f32[1,128], index: 4, kind: input, shape index: {}]   ;;  %s799_s5 = inlined_call_operand.vmem [shape: f32[128,8], index: 5, kind: input, shape index: {}]   ;;  %s800_s6 = inlined_call_operand.vmem [shape: f32[1,8], index: 6, kind: input, shape index: {}]   ;;  %s801_s7 = inlined_call_operand.hbm [shape: f32[8,8], index: 7, kind: output, shape index: {}]  }
   0x1   :  { %13 = vsyncpa [#allocation4], 0  ;;  %s595_s24 = smov [#allocation2]   ;;  %s547_s28 = scalar_lea.hbm %s794_s0, 128 }
   0x2   :  { %s20_s25 = sshll.u32 %s595_s24, 4  ;;  %p548_p0 = scmp.ne.s32.totalorder %s794_s0, %s547_s28  ;;  %s21_s25 = int_to_ptr.vmem [resolvable:$true] %s20_s25 }
   0x3   :  { %p551_p1 = scmp.lt.u32.totalorder %s547_s28, %s794_s0 }
   0x5   :  { %p553_p2 = pnand %p551_p1, %p548_p0 }
   0x7   :  { %556 = shalt.err (!%p553_p2)
}
   0x8   :  { %s557_s10 = scalar_lea.vmem %s21_s25, 128  ;;  %p562_p4 = scmp.lt.s32.totalorder %s21_s25, %s21_s25 }
   0x9   :  { %p558_p3 = scmp.ne.s32.totalorder %s21_s25, %s557_s10  ;;  %p563_p5 = scmp.lt.s32.totalorder %s557_s10, %s557_s10 }
   0xb   :  { %p564_p6 = por %p563_p5, %p562_p4 }
   0xd   :  { %p565_p7 = pnand %p564_p6, %p558_p3 }
   0xf   :  { %568 = shalt.err (!%p565_p7)
}
  0x10   :  { %23 = dma.hbm_to_vmem [thread:$0]  %s794_s0, 128, %s21_s25, [#allocation3]  }
  0x11   :  { %591 = dma.done.wait [#allocation3], 128  }
  0x12   :  { %592 = vsyncadd [#allocation3], 4294967168  ;;  %v596_v0 = vmov 0.0|0.0   ;;  %vm597_vm0 = vmmov 0   ;;  %v598_v1 = vmov 0.0   ;;  %v39_v2 = vld [vmem:[%s795_s1] sm:$0xff] }
  0x13   :  { %480 = vmatprep.subr.bf16.mxu0 %v596_v0  ;;  %407 = vmatprep.mubr.msk.f32.mxu0 %vm597_vm0, %v598_v1  ;;  %v40_v3 = vld [vmem:[%s795_s1 + $0x8] sm:$0xff]  ;;  %v41_v5 = vld [vmem:[#allocation2] sm:$0xff]  ;;  %vm49_vm1 = vcmask 130048   ;;  %v136_v9 = vld [vmem:[%s797_s3 + $0x10] sm:$0xff]  ;;  %s600_s29 = smov 127   ;;  %s601_s30 = smov [#allocation5]  }
  0x14   :  { %483 = vmatprep.subr.bf16.mxu1 %v596_v0  ;;  %442 = vmatprep.mubr.msk.f32.mxu1 %vm597_vm0, %v598_v1  ;;  %v481_v4 = vpack.c.bf16 %v40_v3, %v39_v2  ;;  %v134_v6 = vld [vmem:[%s797_s3] sm:$0xff]  ;;  %v135_v7 = vld [vmem:[%s797_s3 + $0x8] sm:$0xff]  ;;  %v137_v10 = vld [vmem:[%s797_s3 + $0x18] sm:$0xff]  ;;  %s353_s8 = sshll.u32 %s601_s30, 4  ;;  %vm345_vm5 = vcmask 64512   ;;  %s354_s8 = int_to_ptr.vmem [resolvable:$true] %s353_s8 }
  0x15   :  { %v484_v8 = vpack.c.bf16 %v135_v7, %v134_v6  ;;  %v487_v11 = vpack.c.bf16 %v137_v10, %v136_v9  ;;  %v138_v12 = vld [vmem:[%s797_s3 + $0x20] sm:$0xff]  ;;  %v139_v13 = vld [vmem:[%s797_s3 + $0x28] sm:$0xff]  ;;  %v140_v15 = vld [vmem:[%s797_s3 + $0x30] sm:$0xff]  ;;  %s569_s9 = scalar_lea.vmem %s354_s8, 128  ;;  %p574_p9 = scmp.lt.s32.totalorder %s354_s8, %s354_s8 }
  0x16   :  { %482 = vmatpush3.bf16.msra.mxu0 %v481_v4  ;;  %v490_v14 = vpack.c.bf16 %v139_v13, %v138_v12  ;;  %v141_v16 = vld [vmem:[%s797_s3 + $0x38] sm:$0xff]  ;;  %v142_v18 = vld [vmem:[%s797_s3 + $0x40] sm:$0xff]  ;;  %v143_v19 = vld [vmem:[%s797_s3 + $0x48] sm:$0xff]  ;;  %p570_p8 = scmp.ne.s32.totalorder %s354_s8, %s569_s9  ;;  %p575_p10 = scmp.lt.s32.totalorder %s569_s9, %s569_s9 }
  0x17   :  { %507 = vmatprep.subr.bf16.mxu0 %v596_v0  ;;  %485 = vmatpush3.bf16.msra.mxu1 %v484_v8  ;;  %v493_v17 = vpack.c.bf16 %v141_v16, %v140_v15  ;;  %v496_v20 = vpack.c.bf16 %v143_v19, %v142_v18  ;;  %v144_v21 = vld [vmem:[%s797_s3 + $0x50] sm:$0xff]  ;;  %v145_v22 = vld [vmem:[%s797_s3 + $0x58] sm:$0xff]  ;;  %v146_v24 = vld [vmem:[%s797_s3 + $0x60] sm:$0xff]  ;;  %v599_v18 = vmov 0  }
  0x18   :  { %486 = vmatprep.subr.bf16.mxu1 %v596_v0  ;;  %v499_v23 = vpack.c.bf16 %v145_v22, %v144_v21  ;;  %v147_v25 = vld [vmem:[%s797_s3 + $0x68] sm:$0xff]  ;;  %v148_v27 = vld [vmem:[%s797_s3 + $0x70] sm:$0xff]  ;;  %v149_v28 = vld [vmem:[%s797_s3 + $0x78] sm:$0xff]  ;;  %538 = vset.pattern.permute.xlu0 %v599_v18  ;;  %p576_p11 = por %p575_p10, %p574_p9 }
  0x19   :  { %408 = vmatmul.mubr.msk.f32.vlgmr.msra.gmra.mrb[0].mxu0 %vm49_vm1, %v41_v5  ;;  %v502_v26 = vpack.c.bf16 %v147_v25, %v146_v24  ;;  %v505_v29 = vpack.c.bf16 %v149_v28, %v148_v27  ;;  %v362_v30 = vld [vmem:[%s796_s2] ss:$0 sm:$0xff]  ;;  %v239_v45 = vld [vmem:[%s799_s5 + $0x8] sm:$0xff]  ;;  %v240_v47 = vld [vmem:[%s799_s5 + $0x10] sm:$0xff]  ;;  %v336_v25 = vlaneseq }
  0x1a   :  { %477 = vmatprep.mubr.msk.f32.mxu0 %vm597_vm0, %v598_v1  ;;  %v238_v44 = vld [vmem:[%s799_s5] sm:$0xff]  ;;  %v241_v48 = vld [vmem:[%s799_s5 + $0x18] sm:$0xff]  ;;  %v243_v51 = vld [vmem:[%s799_s5 + $0x28] sm:$0xff]  ;;  %p577_p12 = pnand %p576_p11, %p570_p8 }
  0x1b   :  { %488 = vmatpush3.bf16.msra.mxu1 %v487_v11  ;;  %v508_v46 = vpack.c.bf16 %v239_v45, %v238_v44  ;;  %v511_v49 = vpack.c.bf16 %v241_v48, %v240_v47  ;;  %v242_v50 = vld [vmem:[%s799_s5 + $0x20] sm:$0xff]  ;;  %v244_v53 = vld [vmem:[%s799_s5 + $0x30] sm:$0xff]  ;;  %v245_v54 = vld [vmem:[%s799_s5 + $0x38] sm:$0xff] }
  0x1c   :  { %489 = vmatprep.subr.bf16.mxu1 %v596_v0  ;;  %v514_v52 = vpack.c.bf16 %v243_v51, %v242_v50  ;;  %v517_v55 = vpack.c.bf16 %v245_v54, %v244_v53  ;;  %v246_v56 = vld [vmem:[%s799_s5 + $0x40] sm:$0xff]  ;;  %v247_v57 = vld [vmem:[%s799_s5 + $0x48] sm:$0xff]  ;;  %v248_v59 = vld [vmem:[%s799_s5 + $0x50] sm:$0xff] }
  0x1d   :  { %509 = vmatpush3.bf16.msra.mxu0 %v508_v46  ;;  %v520_v58 = vpack.c.bf16 %v247_v57, %v246_v56  ;;  %v249_v60 = vld [vmem:[%s799_s5 + $0x58] sm:$0xff]  ;;  %v250_v62 = vld [vmem:[%s799_s5 + $0x60] sm:$0xff]  ;;  %v251_v63 = vld [vmem:[%s799_s5 + $0x68] sm:$0xff] }
  0x1e   :  { %510 = vmatprep.subr.bf16.mxu0 %v596_v0  ;;  %v523_v61 = vpack.c.bf16 %v249_v60, %v248_v59  ;;  %v526_v1 = vpack.c.bf16 %v251_v63, %v250_v62  ;;  %v252_v2 = vld [vmem:[%s799_s5 + $0x70] sm:$0xff]  ;;  %v253_v3 = vld [vmem:[%s799_s5 + $0x78] sm:$0xff]  ;;  %v364_v5 = vld [vmem:[%s798_s4] ss:$0 sm:$0xff] }
  0x1f   :  { %491 = vmatpush3.bf16.msra.mxu1 %v490_v14  ;;  %v529_v4 = vpack.c.bf16 %v253_v3, %v252_v2  ;;  %v365_v19 = vld [vmem:[%s800_s6] ss:$0 sm:$0xff] }
  0x20   :  { %492 = vmatprep.subr.bf16.mxu1 %v596_v0 }
  0x21   :  { %512 = vmatpush3.bf16.msra.mxu0 %v511_v49 }
  0x22   :  { %513 = vmatprep.subr.bf16.mxu0 %v596_v0 }
  0x23   :  { %494 = vmatpush3.bf16.msra.mxu1 %v493_v17 }
  0x24   :  { %495 = vmatprep.subr.bf16.mxu1 %v596_v0 }
  0x25   :  { %515 = vmatpush3.bf16.msra.mxu0 %v514_v52 }
  0x26   :  { %516 = vmatprep.subr.bf16.mxu0 %v596_v0 }
  0x27   :  { %497 = vmatpush3.bf16.msra.mxu1 %v496_v20 }
  0x28   :  { %498 = vmatprep.subr.bf16.mxu1 %v596_v0 }
  0x29   :  { %518 = vmatpush3.bf16.msra.mxu0 %v517_v55 }
  0x2a   :  { %519 = vmatprep.subr.bf16.mxu0 %v596_v0 }
  0x2b   :  { %500 = vmatpush3.bf16.msra.mxu1 %v499_v23 }
  0x2c   :  { %501 = vmatprep.subr.bf16.mxu1 %v596_v0 }
  0x2d   :  { %521 = vmatpush3.bf16.msra.mxu0 %v520_v58 }
  0x2e   :  { %522 = vmatprep.subr.bf16.mxu0 %v596_v0 }
  0x2f   :  { %503 = vmatpush3.bf16.msra.mxu1 %v502_v26  ;;  %v337_v26 = vand.u32 127, %v336_v25 }
  0x30   :  { %504 = vmatprep.subr.bf16.mxu1 %v596_v0 }
  0x31   :  { %524 = vmatpush3.bf16.msra.mxu0 %v523_v61  ;;  %vm338_vm4 = vcmp.eq.s32.totalorder %v337_v26, 2 }
  0x32   :  { %525 = vmatprep.subr.bf16.mxu0 %v596_v0 }
  0x33   :  { %506 = vmatpush3.bf16.msra.mxu1 %v505_v29 }
  0x35   :  { %527 = vmatpush3.bf16.msra.mxu0 %v526_v1 }
  0x36   :  { %528 = vmatprep.subr.bf16.mxu0 %v596_v0 }
  0x39   :  { %530 = vmatpush3.bf16.msra.mxu0 %v529_v4 }
  0xec   :  { %v119_v31 = vpop.f32.mrb[0].mxu0 }
  0xed   :  { %v120_v32 = vadd.f32 %v362_v30, %v119_v31  ;;  %v409_v33 = vpop.f32.mrb[1].mxu0 }
  0xef   :  { %v123_v34 = vmin.f32 %v120_v32, 20.0  ;;  %vm131_vm2 = vcmp.gt.f32.partialorder %v120_v32, 20.0 }
  0xf1   :  { %v124_v35 = vmul.f32 1.442695, %v123_v34 }
  0xf3   :  { %539 = vpow2.f32 %v124_v35 }
  0xfd   :  { %v540_v36 = vpop.eup %539 }
  0xfe   :  { %v126_v37 = vadd.f32 2.0, %v540_v36 }
 0x100   :  { %v127_v38 = vmul.f32 %v540_v36, %v126_v37 }
 0x102   :  { %v128_v39 = vadd.f32 2.0, %v127_v38 }
 0x104   :  { %541 = vrcp.f32 %v128_v39 }
 0x10e   :  { %v542_v40 = vpop.eup %541 }
 0x10f   :  { %v130_v41 = vmul.f32 %v542_v40, %v127_v38 }
 0x111   :  { %v132_v42 = vmul.f32 %v130_v41, %v120_v32 }
 0x113   :  { %v133_v43 = vsel %vm131_vm2, %v120_v32, %v132_v42 }
 0x114   :  { %443 = vmatmul.mubr.f32.vlgmr.msra.gmra.mrb[0].mxu1 %v133_v43 }
 0x1e7   :  { %v223_v6 = vpop.f32.mrb[0].mxu1 }
 0x1e8   :  { %v224_v7 = vadd.f32 %v364_v5, %v223_v6  ;;  %v444_v8 = vpop.f32.mrb[1].mxu1 }
 0x1ea   :  { %v227_v9 = vmin.f32 %v224_v7, 20.0  ;;  %vm235_vm3 = vcmp.gt.f32.partialorder %v224_v7, 20.0 }
 0x1ec   :  { %v228_v10 = vmul.f32 1.442695, %v227_v9 }
 0x1ee   :  { %543 = vpow2.f32 %v228_v10 }
 0x1f8   :  { %v544_v11 = vpop.eup %543 }
 0x1f9   :  { %v230_v12 = vadd.f32 2.0, %v544_v11 }
 0x1fb   :  { %v231_v13 = vmul.f32 %v544_v11, %v230_v12 }
 0x1fd   :  { %v232_v14 = vadd.f32 2.0, %v231_v13 }
 0x1ff   :  { %545 = vrcp.f32 %v232_v14 }
 0x209   :  { %v546_v15 = vpop.eup %545 }
 0x20a   :  { %v234_v16 = vmul.f32 %v546_v15, %v231_v13 }
 0x20c   :  { %v236_v17 = vmul.f32 %v234_v16, %v224_v7 }
 0x20e   :  { %v237_v0 = vsel %vm235_vm3, %v224_v7, %v236_v17 }
 0x20f   :  { %478 = vmatmul.mubr.f32.vlgmr.msra.gmra.mrb[2].mxu0 %v237_v0 }
 0x2e2   :  { %v327_v20 = vpop.f32.mrb[2].mxu0 }
 0x2e3   :  { %v328_v21 = vadd.f32 %v365_v19, %v327_v20  ;;  %v479_v22 = vpop.f32.mrb[3].mxu0 }
 0x2e5   :  { %332 = vrot.lane.b32.xlu0 %v328_v21, %s600_s29 }
 0x357   :  { %v333_v23 = vpop.permute.xlu0 %332 }
 0x358   :  { %v335_v24 = vmin.f32 %v328_v21, %v333_v23 }
 0x35a   :  { %341 = vperm.xlu0 %538, %v335_v24  }
 0x3d9   :  { %v342_v27 = vpop.permute.xlu0 %341 }
 0x3da   :  { %v344_v28 = vsel %vm338_vm4, %v342_v27, %v328_v21 }
 0x3db   :  { %346 = vst.msk [vmem:[#allocation5] sm:$0xff] %vm345_vm5, %v344_v28 }
 0x3dc   :  { %580 = shalt.err (!%p577_p12)
}
 0x3dd   :  { %s581_s11 = scalar_lea.hbm %s801_s7, 128 }
 0x3de   :  { %p582_p13 = scmp.ne.s32.totalorder %s801_s7, %s581_s11  ;;  %p585_p0 = scmp.lt.u32.totalorder %s581_s11, %s801_s7 }
 0x3e0   :  { %p587_p1 = pnand %p585_p0, %p582_p13 }
 0x3e2   :  { %590 = shalt.err (!%p587_p1)
}
 0x3e3   :  { %356 = dma.vmem_to_hbm [thread:$0]  %s354_s8, 128, %s801_s7, [#allocation4]  }
 0x3e4   :  { %593 = dma.done.wait [#allocation4], 128  }
 0x3e5   :  { %594 = vsyncadd [#allocation4], 4294967168 }
 0x3e6   :  { %360 = vsyncpa [#allocation3], 1 }
 0x3e7   :  { %361 = vsyncpa [#allocation4], 1 }

</bundles_post_ra>
